<compile_context>
chip_gen: v5e
topology: v5e:2x2
jax: 0.10.0
libtpu: 0.0.40
codegen_flags: <defaults>
</compile_context>

<pallas_src>
import jax
import jax.numpy as jnp
from jax.experimental import pallas as pl
from jax.experimental.pallas import tpu as pltpu


def _round_up(x, m):
    return ((x + m - 1) // m) * m


def _padded_lanes(c):
    # Last-dim VMEM padding: at least one 128-wide lane group.
    return max(128, _round_up(c, 128))


def timestep_embedding_kernel(sample_ref, cond_ref, w1_ref, wc1_ref, b1_ref,
                              w2_ref, b2_ref, out_ref):
    # sample_ref: (tb, C_in)      cond_ref: (tb, C_cond)
    # w1_ref:  (C_in, D)    bf16  wc1_ref: (C_cond, D)  bf16  (= w_cond @ w1, folded)
    # b1_ref:  (1, D)       f32
    # w2_ref:  (D, D_out)   bf16  b2_ref:  (1, D_out)   f32
    # out_ref: (tb, D_out)
    mxu_dt = w1_ref.dtype

    # linear_1 with cond_proj folded in:
    #   h = sample @ W1 + cond @ (Wc @ W1) + b1     (both dots lane-dense, N = D)
    h = jnp.dot(sample_ref[...].astype(mxu_dt), w1_ref[...],
                preferred_element_type=jnp.float32)
    h = h + jnp.dot(cond_ref[...].astype(mxu_dt), wc1_ref[...],
                    preferred_element_type=jnp.float32)
    h = h + b1_ref[...]

    # SiLU: h * sigmoid(h).  sigmoid = 1 / (1 + exp(-h)) with EUP exp and an
    # approximate reciprocal (separate EUP slot -> near free).  Kept in f32 so the
    # same kernel runs on v5e (no bf16 VPU/EUP).
    h = h * pl.reciprocal(1.0 + jnp.exp(-h), approx=True)

    # linear_2 (cast activation to bf16 only at the MXU operand boundary).
    y = jnp.dot(h.astype(mxu_dt), w2_ref[...],
                preferred_element_type=jnp.float32) + b2_ref[...]

    out_ref[...] = y.astype(out_ref.dtype)


def prepare_timestep_embedding_params(w_cond, w1, b1, w2, b2,
                                      mxu_dtype=jnp.bfloat16):
    """One-time parameter prep (hoisted out of the per-step hot path).

    Folds cond_proj into linear_1 in f32, reshapes biases to (1, D), and casts MXU
    operands to bf16.  Weights come in pre-transposed as [in, out].
    """
    w_cond = jnp.asarray(w_cond, jnp.float32)
    w1_f32 = jnp.asarray(w1, jnp.float32)
    # Fold in f32; only the final MXU operand is rounded to bf16.
    wc1 = jnp.dot(w_cond, w1_f32, preferred_element_type=jnp.float32)  # (C_cond, D)
    return dict(
        w1=w1_f32.astype(mxu_dtype),
        wc1=wc1.astype(mxu_dtype),
        b1=jnp.asarray(b1, jnp.float32).reshape(1, -1),
        w2=jnp.asarray(w2, jnp.float32).astype(mxu_dtype),
        b2=jnp.asarray(b2, jnp.float32).reshape(1, -1),
    )


def _choose_batch_tile(B, c_in, c_cond, d_out, in_itemsize, out_itemsize,
                       batch_tile=None, activation_budget_bytes=24 << 20):
    """Pick a batch tile from the *padded*, double-buffered VMEM footprint."""
    # Per-row VMEM bytes for the streamed blocks (padded to 128 lanes, x2 buffers).
    per_row = 2 * (_padded_lanes(c_in) * in_itemsize
                   + _padded_lanes(c_cond) * in_itemsize
                   + _padded_lanes(d_out) * out_itemsize)
    if batch_tile is None:
        tb = max(16, min(8192, activation_budget_bytes // per_row))
        # Guarantee >= 2 grid steps when B is large enough so the "parallel" batch
        # axis can shard across v7x's two TensorCores.
        if B >= 32:
            tb = min(tb, _round_up(pl.cdiv(B, 2), 16))
    else:
        tb = batch_tile
    tb = min(tb, B)
    if tb < B:
        tb = max(16, (tb // 16) * 16)   # multiple of 16: bf16 sublane packing
        tb = min(tb, B)
    return tb, per_row


def timestep_embedding(sample, condition, params, *, batch_tile=None,
                       out_dtype=None):
    """Fused TimestepEmbedding forward. params from prepare_timestep_embedding_params.

    out_dtype: set to jnp.bfloat16 if the consumer accepts bf16 (halves the dominant
    HBM output stream); defaults to sample.dtype.
    """
    w1, wc1, b1, w2, b2 = (params["w1"], params["wc1"], params["b1"],
                           params["w2"], params["b2"])
    B, c_in = sample.shape
    c_cond = condition.shape[1]
    D = w1.shape[1]
    d_out = w2.shape[1]
    out_dtype = sample.dtype if out_dtype is None else out_dtype

    out_itemsize = jnp.dtype(out_dtype).itemsize
    tb, per_row = _choose_batch_tile(
        B, c_in, c_cond, d_out, sample.dtype.itemsize, out_itemsize,
        batch_tile=batch_tile)
    grid = (pl.cdiv(B, tb),)

    # Resident weight/bias VMEM (double-buffered by the pipeline even though static).
    w_bytes = 2 * ((w1.size + wc1.size + w2.size) * w1.dtype.itemsize
                   + (b1.size + b2.size) * 4)
    needed = tb * per_row + w_bytes
    # Raise the scoped-VMEM limit to cover the footprint (+4 MiB headroom); cap at
    # 48 MiB so it stays within v7x's 64 MiB physical VMEM.
    vmem_limit = int(min(48 << 20, max(needed + (4 << 20), 16 << 20)))

    # Activations/output stream over the batch grid axis; weights & biases are
    # VMEM-resident (index_map always returns block (0, 0)).
    batch_spec = lambda cols: pl.BlockSpec((tb, cols), lambda i: (i, 0))
    resident = lambda shape: pl.BlockSpec(shape, lambda i: (0, 0))

    flops = 2 * B * D * (c_in + c_cond) + 2 * B * D * d_out + 4 * B * D + B * d_out
    bytes_accessed = (
        sample.size * sample.dtype.itemsize
        + condition.size * condition.dtype.itemsize
        + (w1.size + wc1.size + w2.size) * w1.dtype.itemsize
        + (b1.size + b2.size) * 4
        + B * d_out * out_itemsize
    )

    return pl.pallas_call(
        timestep_embedding_kernel,
        out_shape=jax.ShapeDtypeStruct((B, d_out), out_dtype),
        grid_spec=pltpu.PrefetchScalarGridSpec(
            num_scalar_prefetch=0,
            grid=grid,
            in_specs=[
                batch_spec(c_in),              # sample        (streamed)
                batch_spec(c_cond),            # condition     (streamed)
                resident((c_in, D)),           # w1            (bf16, resident)
                resident((c_cond, D)),         # w_cond @ w1   (bf16, resident)
                resident((1, D)),              # b1            (f32,  resident)
                resident((D, d_out)),          # w2            (bf16, resident)
                resident((1, d_out)),          # b2            (f32,  resident)
            ],
            out_specs=batch_spec(d_out),
        ),
        compiler_params=pltpu.CompilerParams(
            dimension_semantics=("parallel",),
            vmem_limit_bytes=vmem_limit,
        ),
        cost_estimate=pl.CostEstimate(
            flops=flops, transcendentals=B * D, bytes_accessed=bytes_accessed),
    )(sample, condition, w1, wc1, b1, w2, b2)


if __name__ == "__main__":
    # Module config (small, consistent with TimestepEmbedding.__init__):
    #   in_channels=32, time_embed_dim=128, act_fn='silu',
    #   out_dim=None (-> time_embed_dim_out=128), cond_proj_dim=16, bias=True
    B, C_IN, D, C_COND = 8, 32, 128, 16

    key = jax.random.PRNGKey(0)
    ks = jax.random.split(key, 7)

    sample = jax.random.normal(ks[0], (B, C_IN), dtype=jnp.float32)
    condition = jax.random.normal(ks[1], (B, C_COND), dtype=jnp.float32)

    # Deterministic synthetic parameters (stored as [in, out], i.e. torch W.T).
    w_cond = jax.random.normal(ks[2], (C_COND, C_IN), dtype=jnp.float32) * 0.05
    w1 = jax.random.normal(ks[3], (C_IN, D), dtype=jnp.float32) * 0.05
    b1 = jax.random.normal(ks[4], (D,), dtype=jnp.float32) * 0.05
    w2 = jax.random.normal(ks[5], (D, D), dtype=jnp.float32) * 0.05
    b2 = jax.random.normal(ks[6], (D,), dtype=jnp.float32) * 0.05

    # One-time prep (fold cond_proj, reshape biases, cast MXU operands to bf16).
    params = prepare_timestep_embedding_params(w_cond, w1, b1, w2, b2)

    fwd = jax.jit(lambda s, c: timestep_embedding(s, c, params))
    out = jax.block_until_ready(fwd(sample, condition))

    # Pure-JAX f32 reference (unfused, unfolded).
    x_ref = sample + condition @ w_cond
    h_ref = x_ref @ w1 + b1
    h_ref = h_ref * jax.nn.sigmoid(h_ref)
    y_ref = h_ref @ w2 + b2

    assert out.shape == (B, D)
    # bf16 MXU operands + approx reciprocal -> tolerance loosened vs. pure-f32 ref.
    assert jnp.allclose(out, y_ref, atol=1e-2, rtol=1e-2), \
        float(jnp.max(jnp.abs(out - y_ref)))

    print("KERNEL_OK")
</pallas_src>

<mosaic_0001>
module attributes {stable_mosaic.version = 11 : i64} {
  func.func @timestep_embedding_kernel(%arg0: i32, %arg1: memref<8x32xf32, #tpu.memory_space<vmem>>, %arg2: memref<8x16xf32, #tpu.memory_space<vmem>>, %arg3: memref<32x128xbf16, #tpu.memory_space<vmem>>, %arg4: memref<16x128xbf16, #tpu.memory_space<vmem>>, %arg5: memref<1x128xf32, #tpu.memory_space<vmem>>, %arg6: memref<128x128xbf16, #tpu.memory_space<vmem>>, %arg7: memref<1x128xf32, #tpu.memory_space<vmem>>, %arg8: memref<8x128xf32, #tpu.memory_space<vmem>>) attributes {dimension_semantics = [#tpu.dimension_semantics<parallel>], iteration_bounds = array<i64: 1>, scalar_prefetch = 0 : i64, scratch_operands = 0 : i64, tpu.core_type = #tpu.core_type<tc>, window_params = [{transform_indices = @transform_0, window_bounds = array<i64: 8, 32>}, {transform_indices = @transform_1, window_bounds = array<i64: 8, 16>}, {pipeline_mode = #tpu.pipeline_mode<synchronous>, transform_indices = @transform_2, window_bounds = array<i64: 32, 128>}, {pipeline_mode = #tpu.pipeline_mode<synchronous>, transform_indices = @transform_3, window_bounds = array<i64: 16, 128>}, {pipeline_mode = #tpu.pipeline_mode<synchronous>, transform_indices = @transform_4, window_bounds = array<i64: 1, 128>}, {pipeline_mode = #tpu.pipeline_mode<synchronous>, transform_indices = @transform_5, window_bounds = array<i64: 128, 128>}, {pipeline_mode = #tpu.pipeline_mode<synchronous>, transform_indices = @transform_6, window_bounds = array<i64: 1, 128>}, {transform_indices = @transform_7, window_bounds = array<i64: 8, 128>}]} {
    %c0 = arith.constant 0 : index
    %c0_0 = arith.constant 0 : index
    %0 = vector.load %arg1[%c0, %c0_0] : memref<8x32xf32, #tpu.memory_space<vmem>>, vector<8x32xf32>
    %1 = arith.truncf %0 : vector<8x32xf32> to vector<8x32xbf16>
    %c0_1 = arith.constant 0 : index
    %c0_2 = arith.constant 0 : index
    %2 = vector.load %arg3[%c0_1, %c0_2] : memref<32x128xbf16, #tpu.memory_space<vmem>>, vector<32x128xbf16>
    %cst = arith.constant dense<0.000000e+00> : vector<8x128xf32>
    %3 = tpu.matmul %1, %2, %cst {dimension_numbers = #tpu.dot_dimension_numbers<[1], [0], [0], [1], [0, 0, 1, 1], [], []>} : vector<8x32xbf16>, vector<32x128xbf16>, vector<8x128xf32> -> vector<8x128xf32>
    %c0_3 = arith.constant 0 : index
    %c0_4 = arith.constant 0 : index
    %4 = vector.load %arg2[%c0_3, %c0_4] : memref<8x16xf32, #tpu.memory_space<vmem>>, vector<8x16xf32>
    %5 = arith.truncf %4 : vector<8x16xf32> to vector<8x16xbf16>
    %c0_5 = arith.constant 0 : index
    %c0_6 = arith.constant 0 : index
    %6 = vector.load %arg4[%c0_5, %c0_6] : memref<16x128xbf16, #tpu.memory_space<vmem>>, vector<16x128xbf16>
    %cst_7 = arith.constant dense<0.000000e+00> : vector<8x128xf32>
    %7 = tpu.matmul %5, %6, %cst_7 {dimension_numbers = #tpu.dot_dimension_numbers<[1], [0], [0], [1], [0, 0, 1, 1], [], []>} : vector<8x16xbf16>, vector<16x128xbf16>, vector<8x128xf32> -> vector<8x128xf32>
    %8 = arith.addf %3, %7 : vector<8x128xf32>
    %c0_8 = arith.constant 0 : index
    %c0_9 = arith.constant 0 : index
    %9 = vector.load %arg5[%c0_8, %c0_9] : memref<1x128xf32, #tpu.memory_space<vmem>>, vector<1x128xf32>
    %10 = vector.broadcast %9 : vector<1x128xf32> to vector<8x128xf32>
    %11 = arith.addf %8, %10 : vector<8x128xf32>
    %cst_10 = arith.constant 0.000000e+00 : f32
    %12 = vector.broadcast %cst_10 : f32 to vector<8x128xf32>
    %13 = arith.subf %12, %11 : vector<8x128xf32>
    %14 = math.exp %13 : vector<8x128xf32>
    %cst_11 = arith.constant 1.000000e+00 : f32
    %15 = vector.broadcast %cst_11 : f32 to vector<8x128xf32>
    %16 = arith.addf %15, %14 : vector<8x128xf32>
    %17 = tpu.reciprocal %16 {approx = true} : vector<8x128xf32> -> vector<8x128xf32>
    %18 = arith.mulf %11, %17 : vector<8x128xf32>
    %19 = arith.truncf %18 : vector<8x128xf32> to vector<8x128xbf16>
    %c0_12 = arith.constant 0 : index
    %c0_13 = arith.constant 0 : index
    %20 = vector.load %arg6[%c0_12, %c0_13] : memref<128x128xbf16, #tpu.memory_space<vmem>>, vector<128x128xbf16>
    %cst_14 = arith.constant dense<0.000000e+00> : vector<8x128xf32>
    %21 = tpu.matmul %19, %20, %cst_14 {dimension_numbers = #tpu.dot_dimension_numbers<[1], [0], [0], [1], [0, 0, 1, 1], [], []>} : vector<8x128xbf16>, vector<128x128xbf16>, vector<8x128xf32> -> vector<8x128xf32>
    %c0_15 = arith.constant 0 : index
    %c0_16 = arith.constant 0 : index
    %22 = vector.load %arg7[%c0_15, %c0_16] : memref<1x128xf32, #tpu.memory_space<vmem>>, vector<1x128xf32>
    %23 = vector.broadcast %22 : vector<1x128xf32> to vector<8x128xf32>
    %24 = arith.addf %21, %23 : vector<8x128xf32>
    %c0_17 = arith.constant 0 : index
    %c0_18 = arith.constant 0 : index
    %25 = vector.load %arg8[%c0_17, %c0_18] : memref<8x128xf32, #tpu.memory_space<vmem>>, vector<8x128xf32>
    tpu.vector_store %arg8[%c0_17, %c0_18], %24 {strides = array<i32>} : memref<8x128xf32, #tpu.memory_space<vmem>>, vector<8x128xf32>,
    return
  }
  func.func @transform_0(%arg0: i32) -> (i32, i32) {
    %c0_i32 = arith.constant 0 : i32
    %c0_i32_0 = arith.constant 0 : i32
    return %arg0, %c0_i32 : i32, i32
  }
  func.func @transform_1(%arg0: i32) -> (i32, i32) {
    %c0_i32 = arith.constant 0 : i32
    %c0_i32_0 = arith.constant 0 : i32
    return %arg0, %c0_i32 : i32, i32
  }
  func.func @transform_2(%arg0: i32) -> (i32, i32) {
    %c0_i32 = arith.constant 0 : i32
    %c0_i32_0 = arith.constant 0 : i32
    %c0_i32_1 = arith.constant 0 : i32
    return %c0_i32, %c0_i32_0 : i32, i32
  }
  func.func @transform_3(%arg0: i32) -> (i32, i32) {
    %c0_i32 = arith.constant 0 : i32
    %c0_i32_0 = arith.constant 0 : i32
    %c0_i32_1 = arith.constant 0 : i32
    return %c0_i32, %c0_i32_0 : i32, i32
  }
  func.func @transform_4(%arg0: i32) -> (i32, i32) {
    %c0_i32 = arith.constant 0 : i32
    %c0_i32_0 = arith.constant 0 : i32
    %c0_i32_1 = arith.constant 0 : i32
    return %c0_i32, %c0_i32_0 : i32, i32
  }
  func.func @transform_5(%arg0: i32) -> (i32, i32) {
    %c0_i32 = arith.constant 0 : i32
    %c0_i32_0 = arith.constant 0 : i32
    %c0_i32_1 = arith.constant 0 : i32
    return %c0_i32, %c0_i32_0 : i32, i32
  }
  func.func @transform_6(%arg0: i32) -> (i32, i32) {
    %c0_i32 = arith.constant 0 : i32
    %c0_i32_0 = arith.constant 0 : i32
    %c0_i32_1 = arith.constant 0 : i32
    return %c0_i32, %c0_i32_0 : i32, i32
  }
  func.func @transform_7(%arg0: i32) -> (i32, i32) {
    %c0_i32 = arith.constant 0 : i32
    %c0_i32_0 = arith.constant 0 : i32
    return %arg0, %c0_i32 : i32, i32
  }
}

</mosaic_0001>

<bundles_post_ra>
// kernel: _lambda_.1
= control target key start
LH: loop header
LB: loop body
LE: loop exit
PB: predicated region body
PF: predicated region fallthrough
CT: control target
= control target key end

     0   :  { %12 = vsyncpa [#allocation3], 0  ;;  %s572_s0 = inlined_call_operand.hbm [shape: f32[8,32], index: 0, kind: input, shape index: {}]   ;;  %s573_s1 = inlined_call_operand.hbm [shape: f32[8,16], index: 1, kind: input, shape index: {}]   ;;  %s574_s2 = inlined_call_operand.hbm [shape: bf16[32,128], index: 2, kind: input, shape index: {}]   ;;  %s575_s3 = inlined_call_operand.hbm [shape: bf16[16,128], index: 3, kind: input, shape index: {}]   ;;  %s576_s4 = inlined_call_operand.vmem [shape: f32[1,128], index: 4, kind: input, shape index: {}]   ;;  %s577_s5 = inlined_call_operand.hbm [shape: bf16[128,128], index: 5, kind: input, shape index: {}]   ;;  %s578_s6 = inlined_call_operand.vmem [shape: f32[1,128], index: 6, kind: input, shape index: {}]   ;;  %s579_s7 = inlined_call_operand.hbm [shape: f32[8,128], index: 7, kind: output, shape index: {}]  }
   0x1   :  { %13 = vsyncpa [#allocation6], 0 }
   0x2   :  { %14 = vsyncpa [#allocation9], 0  ;;  %s32_s26 = sshll.u32 %s573_s1, 4  ;;  %s33_s26 = int_to_ptr.hbm [resolvable:$true] %s32_s26 }
   0x3   :  { %15 = vsyncpa [#allocation4], 0  ;;  %s500_s27 = smov [#allocation5]   ;;  %s55_s8 = sshll.u32 %s575_s3, 4  ;;  %s56_s8 = int_to_ptr.hbm [resolvable:$true] %s55_s8 }
   0x4   :  { %s34_s28 = sshll.u32 %s500_s27, 4  ;;  %s501_s9 = smov [#allocation8]   ;;  %s35_s28 = int_to_ptr.vmem [resolvable:$true] %s34_s28 }
   0x5   :  { %37 = dma.hbm_to_vmem [thread:$0]  %s33_s26, 128, %s35_s28, [#allocation6]  }
   0x6   :  { %s57_s10 = sshll.u32 %s501_s9, 4  ;;  %s21_s13 = sshll.u32 %s572_s0, 4  ;;  %s58_s10 = int_to_ptr.vmem [resolvable:$true] %s57_s10  ;;  %s22_s13 = int_to_ptr.hbm [resolvable:$true] %s21_s13 }
   0x7   :  { %s502_s1 = smov 64   ;;  %s503_s14 = smov 4  }
   0x8   :  { %63 = dma.hbm_to_vmem [thread:$0]  %s56_s8, 128, %s58_s10, [#allocation9], %s502_s1, %s502_s1, %s503_s14  }
   0x9   :  { %s42_s17 = sshll.u32 %s574_s2, 4  ;;  %s504_s18 = smov [#allocation2]   ;;  %s43_s17 = int_to_ptr.hbm [resolvable:$true] %s42_s17 }
   0xa   :  { %s23_s19 = sshll.u32 %s504_s18, 4  ;;  %s505_s3 = smov [#allocation7]   ;;  %s24_s19 = int_to_ptr.vmem [resolvable:$true] %s23_s19 }
   0xb   :  { %26 = dma.hbm_to_vmem [thread:$0]  %s22_s13, 128, %s24_s19, [#allocation3]  }
   0xc   :  { %s44_s20 = sshll.u32 %s505_s3, 4  ;;  %s70_s0 = sshll.u32 %s577_s5, 4  ;;  %s45_s20 = int_to_ptr.vmem [resolvable:$true] %s44_s20  ;;  %s71_s0 = int_to_ptr.hbm [resolvable:$true] %s70_s0 }
   0xd   :  { %50 = dma.hbm_to_vmem [thread:$0]  %s43_s17, 256, %s45_s20, [#allocation6], %s502_s1, %s502_s1, %s503_s14  }
   0xe   :  { %s506_s23 = smov [#allocation10]  }
   0xf   :  { %s72_s24 = sshll.u32 %s506_s23, 4  ;;  %s73_s24 = int_to_ptr.vmem [resolvable:$true] %s72_s24 }
  0x10   :  { %78 = dma.hbm_to_vmem [thread:$0]  %s71_s0, 1024, %s73_s24, [#allocation9], %s502_s1, %s502_s1, %s503_s14  }
  0x11   :  { %492 = dma.done.wait [#allocation3], 128  }
  0x12   :  { %493 = vsyncadd [#allocation3], 4294967168 }
  0x13   :  { %494 = dma.done.wait [#allocation6], 384  }
  0x14   :  { %495 = vsyncadd [#allocation6], 4294966912 }
  0x15   :  { %496 = dma.done.wait [#allocation9], 1152  }
  0x16   :  { %497 = vsyncadd [#allocation9], 4294966144  ;;  %v325_v0 = vld [vmem:[#allocation8] sm:$0xff]  ;;  %v324_v1 = vld [vmem:[#allocation7 + $0x8] sm:$0xff]  ;;  %vm118_vm0 = vcmask 130048   ;;  %vm147_vm1 = vcmask 261120  }
  0x17   :  { %v108_v2 = vld [vmem:[#allocation5] sm:$0xff]  ;;  %129 = vmatpush.bf16.msra.mxu0 %v325_v0  ;;  %157 = vmatpush.bf16.msra.mxu1 %v324_v1  ;;  %v323_v4 = vld [vmem:[#allocation7] sm:$0xff]  ;;  %v102_v5 = vld [vmem:[#allocation2] sm:$0xff]  ;;  %s265_s30 = sshll.u32 %s579_s7, 4  ;;  %s266_s30 = int_to_ptr.hbm [resolvable:$true] %s265_s30 }
  0x18   :  { %v109_v3 = vpack.c.bf16 %v108_v2, %v108_v2  ;;  %v103_v6 = vpack.c.bf16 %v102_v5, %v102_v5  ;;  %v333_v7 = vld [vmem:[#allocation10 + $0x38] sm:$0xff]  ;;  %v332_v8 = vld [vmem:[#allocation10 + $0x30] sm:$0xff]  ;;  %v331_v9 = vld [vmem:[#allocation10 + $0x28] sm:$0xff] }
  0x19   :  { %244 = vmatpush.bf16.msra.mxu2 %v333_v7  ;;  %v330_v10 = vld [vmem:[#allocation10 + $0x20] sm:$0xff]  ;;  %v329_v11 = vld [vmem:[#allocation10 + $0x18] sm:$0xff]  ;;  %v328_v12 = vld [vmem:[#allocation10 + $0x10] sm:$0xff] }
  0x1a   :  { %281 = vmatmul.msk.bf16.vlgmr.msra.gmra.mxu0 %vm118_vm0, %v109_v3  ;;  %v327_v13 = vld [vmem:[#allocation10 + $0x8] sm:$0xff]  ;;  %v326_v14 = vld [vmem:[#allocation10] sm:$0xff]  ;;  %v342_v16 = vld [vmem:[%s576_s4] ss:$0 sm:$0xff]  ;;  %s507_s4 = smov [#allocation11]  }
  0x1b   :  { %158 = vmatpush.bf16.msra.mxu1 %v323_v4  ;;  %v343_v29 = vld [vmem:[%s578_s6] ss:$0 sm:$0xff]  ;;  %s263_s27 = sshll.u32 %s507_s4, 4  ;;  %s264_s27 = int_to_ptr.vmem [resolvable:$true] %s263_s27 }
  0x1d   :  { %245 = vmatpush.bf16.msra.mxu2 %v332_v8 }
  0x1e   :  { %290 = vmatmul.msk.bf16.vlgmr.msra.gmra.mxu1 %vm147_vm1, %v103_v6 }
  0x21   :  { %246 = vmatpush.bf16.msra.mxu2 %v331_v9 }
  0x25   :  { %247 = vmatpush.bf16.msra.mxu2 %v330_v10 }
  0x29   :  { %248 = vmatpush.bf16.msra.mxu2 %v329_v11 }
  0x2d   :  { %249 = vmatpush.bf16.msra.mxu2 %v328_v12 }
  0x31   :  { %250 = vmatpush.bf16.msra.mxu2 %v327_v13 }
  0x35   :  { %251 = vmatpush.bf16.msra.mxu2 %v326_v14 }
  0x97   :  { %v131_v15 = vpop.f32.mrf.mxu0 }
  0x9b   :  { %v160_v17 = vpop.f32.mrf.mxu1 }
  0x9c   :  { %v161_v18 = vadd.f32 %v160_v17, %v131_v15 }
  0x9e   :  { %v168_v19 = vadd.f32 %v342_v16, %v161_v18 }
  0x9f   :  { %v133_v20 = vpop.f32.mrf.mxu0 }
  0xa0   :  { %v169_v21 = vsub.f32 0.0, %v168_v19 }
  0xa2   :  { %v170_v22 = vmul.f32 1.442695, %v169_v21 }
  0xa3   :  { %v162_v23 = vpop.f32.mrf.mxu1 }
  0xa4   :  { %344 = vpow2.f32 %v170_v22 }
  0xaa   :  { %v345_v24 = vpop.eup %344 }
  0xab   :  { %v172_v25 = vadd.f32 1.0, %v345_v24 }
  0xad   :  { %346 = vrcp.f32 %v172_v25 }
  0xb3   :  { %v347_v26 = vpop.eup %346 }
  0xb4   :  { %v174_v27 = vmul.f32 %v347_v26, %v168_v19 }
  0xb6   :  { %v175_v28 = vpack.c.bf16 %v174_v27, %v174_v27 }
  0xb8   :  { %252 = vmatmul.bf16.vlgmr.msra.gmra.mxu2 %v175_v28 }
 0x13b   :  { %v253_v30 = vpop.f32.mrf.mxu2 }
 0x13c   :  { %v254_v31 = vadd.f32 %v343_v29, %v253_v30 }
 0x13e   :  { %257 = vst [vmem:[#allocation11] sm:$0xff] %v254_v31 }
 0x13f   :  { %268 = dma.vmem_to_hbm [thread:$0]  %s264_s27, 128, %s266_s30, [#allocation4]  }
 0x143   :  { %v255_v32 = vpop.f32.mrf.mxu2 }
 0x144   :  { %498 = dma.done.wait [#allocation4], 128  }
 0x145   :  { %499 = vsyncadd [#allocation4], 4294967168 }
 0x146   :  { %273 = vsyncpa [#allocation3], 1 }
 0x147   :  { %274 = vsyncpa [#allocation6], 1 }
 0x148   :  { %275 = vsyncpa [#allocation9], 1 }
 0x149   :  { %276 = vsyncpa [#allocation4], 1 }

</bundles_post_ra>
